<compile_context>
chip_gen: v6e
topology: v6e:2x2x1
jax: 0.10.0
libtpu: 0.0.40
codegen_flags: <defaults>
</compile_context>

<pallas_src>
import functools

import jax
import jax.numpy as jnp
from jax.experimental import pallas as pl
from jax.experimental.pallas import tpu as pltpu

_HIDDEN = 256  # fixed by the module: nn.Linear(256, action_dim)


def _actor_last_layer_kernel(x_ref, w_ref, b_ref, o_ref, *, max_action):
    # x_ref : (TB, 256)     VMEM, current batch tile
    # w_ref : (256, A_pad)  VMEM, resident across grid
    # b_ref : (1, A_pad)    VMEM, resident across grid
    # o_ref : (TB, A_pad)   VMEM
    y = jnp.dot(x_ref[...], w_ref[...], preferred_element_type=jnp.float32)
    y = y + b_ref[...]
    o_ref[...] = (max_action * jnp.tanh(y)).astype(o_ref.dtype)


def pad_actor_params(weight, bias):
    """Pad weight/bias columns to a lane-dense multiple of 128.

    Static parameters: call ONCE (e.g. at module init), not per forward.
    """
    H, A = weight.shape
    assert H == _HIDDEN, "module hard-codes nn.Linear(256, action_dim)"
    A_pad = max(128, pl.cdiv(A, 128) * 128)
    w_p = jnp.zeros((H, A_pad), jnp.float32).at[:, :A].set(weight.astype(jnp.float32))
    b_p = jnp.zeros((1, A_pad), jnp.float32).at[0, :A].set(bias.astype(jnp.float32))
    return w_p, b_p


def _pick_batch_tile(B, block_b, min_split_rows=64):
    """Multiple-of-8 batch tile.

    Guarantees >=2 grid steps when the batch is big enough (so v7x's second
    TensorCore isn't idle), while keeping a single tile for tiny batches.
    """
    b8 = ((B + 7) // 8) * 8
    block_b = max(8, (block_b // 8) * 8)
    if b8 <= min_split_rows:
        return min(b8, block_b)
    if b8 <= block_b:
        # Whole batch would fit in one tile: split into two tiles.
        half = ((b8 // 2 + 7) // 8) * 8
        return max(half, 8)
    return block_b


def acs_actor_last_layer_padded(logits, w_p, b_p, max_action, *,
                                block_b=2048, out_dtype=jnp.float32):
    """Core call. Returns the lane-dense padded output (B, A_pad).

    logits: (B, 256) f32; w_p: (256, A_pad); b_p: (1, A_pad); max_action: float.
    """
    B, H = logits.shape
    assert H == _HIDDEN, "module hard-codes nn.Linear(256, action_dim)"
    A_pad = w_p.shape[1]

    tb = _pick_batch_tile(B, block_b)
    grid_b = pl.cdiv(B, tb)          # partial last block handled by Pallas masking

    x = logits.astype(jnp.float32)
    out_itemsize = jnp.dtype(out_dtype).itemsize

    # Double-buffered x tile + double-buffered out tile + resident weight/bias.
    vmem_est = (2 * tb * H * 4
                + 2 * tb * A_pad * out_itemsize
                + 2 * (H + 1) * A_pad * 4)
    cp_kwargs = dict(dimension_semantics=("parallel",))
    if vmem_est > (12 << 20):        # would risk tripping v5e's 16 MiB default
        cp_kwargs["vmem_limit_bytes"] = int(min(vmem_est + (8 << 20), 64 << 20))

    kernel = functools.partial(_actor_last_layer_kernel, max_action=float(max_action))

    out = pl.pallas_call(
        kernel,
        out_shape=jax.ShapeDtypeStruct((B, A_pad), out_dtype),
        grid_spec=pltpu.PrefetchScalarGridSpec(
            num_scalar_prefetch=0,
            grid=(grid_b,),
            in_specs=[
                pl.BlockSpec((tb, H), lambda i: (i, 0)),        # batch tile of x
                pl.BlockSpec((H, A_pad), lambda i: (0, 0)),     # resident weight
                pl.BlockSpec((1, A_pad), lambda i: (0, 0)),     # resident bias
            ],
            out_specs=pl.BlockSpec((tb, A_pad), lambda i: (i, 0)),
        ),
        compiler_params=pltpu.CompilerParams(**cp_kwargs),
    )(x, w_p, b_p)
    return out


def acs_actor_last_layer(logits, weight, bias, max_action, *, block_b=2048):
    """Convenience wrapper matching the PyTorch module signature (pads params
    per call and slices the padded output back to (B, action_dim))."""
    A = weight.shape[1]
    w_p, b_p = pad_actor_params(weight, bias)
    out = acs_actor_last_layer_padded(logits, w_p, b_p, max_action, block_b=block_b)
    return out[:, :A]


if __name__ == "__main__":
    key = jax.random.PRNGKey(0)
    k_x, k_w, k_b = jax.random.split(key, 3)

    batch = 8
    hidden = _HIDDEN       # fixed by the module (nn.Linear(256, action_dim))
    action_dim = 4
    max_action = 2.0

    # Deterministic PyTorch-style init: U(-1/sqrt(fan_in), 1/sqrt(fan_in))
    bound = 1.0 / jnp.sqrt(jnp.float32(hidden))
    weight = jax.random.uniform(k_w, (hidden, action_dim), jnp.float32, -bound, bound)
    bias = jax.random.uniform(k_b, (action_dim,), jnp.float32, -bound, bound)
    logits = jax.random.normal(k_x, (batch, hidden), jnp.float32)

    # Hoist the static-parameter padding out of the per-call path (done once).
    w_p, b_p = pad_actor_params(weight, bias)

    run = jax.jit(functools.partial(acs_actor_last_layer_padded, max_action=max_action))
    out_padded = jax.block_until_ready(run(logits, w_p, b_p))
    out = out_padded[:, :action_dim]

    # Reference check in plain JAX
    ref = max_action * jnp.tanh(logits @ weight + bias[None, :])
    assert out.shape == (batch, action_dim)
    assert jnp.allclose(out, ref, atol=1e-5, rtol=1e-5), "mismatch vs reference"

    # Also exercise the convenience wrapper once.
    out2 = jax.block_until_ready(acs_actor_last_layer(logits, weight, bias, max_action))
    assert jnp.allclose(out2, ref, atol=1e-5, rtol=1e-5), "wrapper mismatch vs reference"

    print("KERNEL_OK")
</pallas_src>

<mosaic_0001>
module attributes {stable_mosaic.version = 11 : i64} {
  func.func @_actor_last_layer_kernel(%arg0: i32, %arg1: memref<8x256xf32, #tpu.memory_space<vmem>>, %arg2: memref<256x128xf32, #tpu.memory_space<vmem>>, %arg3: memref<1x128xf32, #tpu.memory_space<vmem>>, %arg4: memref<8x128xf32, #tpu.memory_space<vmem>>) attributes {dimension_semantics = [#tpu.dimension_semantics<parallel>], iteration_bounds = array<i64: 1>, scalar_prefetch = 0 : i64, scratch_operands = 0 : i64, tpu.core_type = #tpu.core_type<tc>, window_params = [{transform_indices = @transform_0, window_bounds = array<i64: 8, 256>}, {pipeline_mode = #tpu.pipeline_mode<synchronous>, transform_indices = @transform_1, window_bounds = array<i64: 256, 128>}, {pipeline_mode = #tpu.pipeline_mode<synchronous>, transform_indices = @transform_2, window_bounds = array<i64: 1, 128>}, {transform_indices = @transform_3, window_bounds = array<i64: 8, 128>}]} {
    %c0 = arith.constant 0 : index
    %c0_0 = arith.constant 0 : index
    %0 = vector.load %arg1[%c0, %c0_0] : memref<8x256xf32, #tpu.memory_space<vmem>>, vector<8x256xf32>
    %c0_1 = arith.constant 0 : index
    %c0_2 = arith.constant 0 : index
    %1 = vector.load %arg2[%c0_1, %c0_2] : memref<256x128xf32, #tpu.memory_space<vmem>>, vector<256x128xf32>
    %cst = arith.constant dense<0.000000e+00> : vector<8x128xf32>
    %2 = tpu.matmul %0, %1, %cst {dimension_numbers = #tpu.dot_dimension_numbers<[1], [0], [0], [1], [0, 0, 1, 1], [], []>} : vector<8x256xf32>, vector<256x128xf32>, vector<8x128xf32> -> vector<8x128xf32>
    %c0_3 = arith.constant 0 : index
    %c0_4 = arith.constant 0 : index
    %3 = vector.load %arg3[%c0_3, %c0_4] : memref<1x128xf32, #tpu.memory_space<vmem>>, vector<1x128xf32>
    %4 = vector.broadcast %3 : vector<1x128xf32> to vector<8x128xf32>
    %5 = arith.addf %2, %4 : vector<8x128xf32>
    %6 = math.tanh %5 : vector<8x128xf32>
    %cst_5 = arith.constant 2.000000e+00 : f32
    %7 = vector.broadcast %cst_5 : f32 to vector<8x128xf32>
    %8 = arith.mulf %7, %6 : vector<8x128xf32>
    %c0_6 = arith.constant 0 : index
    %c0_7 = arith.constant 0 : index
    %9 = vector.load %arg4[%c0_6, %c0_7] : memref<8x128xf32, #tpu.memory_space<vmem>>, vector<8x128xf32>
    tpu.vector_store %arg4[%c0_6, %c0_7], %8 {strides = array<i32>} : memref<8x128xf32, #tpu.memory_space<vmem>>, vector<8x128xf32>,
    return
  }
  func.func @transform_0(%arg0: i32) -> (i32, i32) {
    %c0_i32 = arith.constant 0 : i32
    %c0_i32_0 = arith.constant 0 : i32
    return %arg0, %c0_i32 : i32, i32
  }
  func.func @transform_1(%arg0: i32) -> (i32, i32) {
    %c0_i32 = arith.constant 0 : i32
    %c0_i32_0 = arith.constant 0 : i32
    %c0_i32_1 = arith.constant 0 : i32
    return %c0_i32, %c0_i32_0 : i32, i32
  }
  func.func @transform_2(%arg0: i32) -> (i32, i32) {
    %c0_i32 = arith.constant 0 : i32
    %c0_i32_0 = arith.constant 0 : i32
    %c0_i32_1 = arith.constant 0 : i32
    return %c0_i32, %c0_i32_0 : i32, i32
  }
  func.func @transform_3(%arg0: i32) -> (i32, i32) {
    %c0_i32 = arith.constant 0 : i32
    %c0_i32_0 = arith.constant 0 : i32
    return %arg0, %c0_i32 : i32, i32
  }
}

</mosaic_0001>

<bundles_post_ra>
// kernel: acs_actor_last_layer_padded.1
= control target key start
LH: loop header
LB: loop body
LE: loop exit
PB: predicated region body
PF: predicated region fallthrough
CT: control target
= control target key end

     0   :  { %8 = vsyncpa [#allocation3], 0  ;;  %s317_s0 = inlined_call_operand.hbm [shape: f32[8,256], index: 0, kind: input, shape index: {}]   ;;  %s318_s1 = inlined_call_operand.hbm [shape: f32[256,128], index: 1, kind: input, shape index: {}]   ;;  %s319_s2 = inlined_call_operand.vmem [shape: f32[1,128], index: 2, kind: input, shape index: {}]   ;;  %s320_s3 = inlined_call_operand.hbm [shape: f32[8,128], index: 3, kind: output, shape index: {}]  }
   0x1   :  { %9 = vsyncpa [#allocation6], 0 }
   0x2   :  { %10 = vsyncpa [#allocation4], 0  ;;  %s280_s12 = smov [#allocation2]   ;;  %s281_s14 = smov [#allocation5]  }
   0x3   :  { %s17_s13 = sshll.u32 %s280_s12, 4  ;;  %s26_s15 = sshll.u32 %s281_s14, 4  ;;  %s18_s13 = int_to_ptr.vmem [resolvable:$true] %s17_s13  ;;  %s27_s15 = int_to_ptr.vmem [resolvable:$true] %s26_s15 }
   0x4   :  { %s222_s16 = scalar_lea.vmem %s18_s13, 256  ;;  %p227_p1 = scmp.lt.s32.totalorder %s18_s13, %s18_s13 }
   0x5   :  { %p223_p0 = scmp.ne.s32.totalorder %s18_s13, %s222_s16  ;;  %p228_p2 = scmp.lt.s32.totalorder %s222_s16, %s222_s16 }
   0x7   :  { %p229_p3 = por %p228_p2, %p227_p1 }
   0x9   :  { %p230_p4 = pnand %p229_p3, %p223_p0 }
   0xb   :  { %233 = shalt.err (!%p230_p4)
}
   0xc   :  { %20 = dma.hbm_to_vmem [thread:$0]  %s317_s0, 256, %s18_s13, [#allocation3]  }
   0xd   :  { %s242_s19 = scalar_lea.vmem %s27_s15, 4096  ;;  %p247_p6 = scmp.lt.s32.totalorder %s27_s15, %s27_s15 }
   0xe   :  { %p243_p5 = scmp.ne.s32.totalorder %s27_s15, %s242_s19  ;;  %p248_p7 = scmp.lt.s32.totalorder %s242_s19, %s242_s19 }
  0x10   :  { %p249_p8 = por %p248_p7, %p247_p6 }
  0x12   :  { %p250_p9 = pnand %p249_p8, %p243_p5 }
  0x14   :  { %253 = shalt.err (!%p250_p9)
}
  0x15   :  { %s282_s20 = smov 128   ;;  %s283_s21 = smov 8  }
  0x16   :  { %32 = dma.hbm_to_vmem [thread:$0]  %s318_s1, 4096, %s27_s15, [#allocation6], %s282_s20, %s282_s20, %s283_s21  }
  0x17   :  { %274 = dma.done.wait [#allocation3], 256  }
  0x18   :  { %275 = vsyncadd [#allocation3], 4294967040 }
  0x19   :  { %276 = dma.done.wait [#allocation6], 4096  }
  0x1a   :  { %277 = vsyncadd [#allocation6], 4294963200  ;;  %v74_v0 = vld [vmem:[#allocation5 + $0xf8] sm:$0xff]  ;;  %v73_v2 = vld [vmem:[#allocation5 + $0xf0] sm:$0xff]  ;;  %s284_s24 = smov [#allocation7]  }
  0x1b   :  { %v58_v1 = vld [vmem:[#allocation5 + $0x78] sm:$0xff]  ;;  %172 = vmatprep.subr.mxu0 %v74_v0  ;;  %v57_v3 = vld [vmem:[#allocation5 + $0x70] sm:$0xff]  ;;  %v72_v4 = vld [vmem:[#allocation5 + $0xe8] sm:$0xff]  ;;  %s161_s25 = sshll.u32 %s284_s24, 4  ;;  %s162_s25 = int_to_ptr.vmem [resolvable:$true] %s161_s25 }
  0x1c   :  { %173 = vmatpush3.msra.mxu0 %v58_v1  ;;  %v56_v5 = vld [vmem:[#allocation5 + $0x68] sm:$0xff]  ;;  %v71_v6 = vld [vmem:[#allocation5 + $0xe0] sm:$0xff]  ;;  %v70_v8 = vld [vmem:[#allocation5 + $0xd8] sm:$0xff]  ;;  %s254_s26 = scalar_lea.vmem %s162_s25, 128  ;;  %p259_p11 = scmp.lt.s32.totalorder %s162_s25, %s162_s25 }
  0x1d   :  { %174 = vmatprep.subr.mxu0 %v73_v2  ;;  %v55_v7 = vld [vmem:[#allocation5 + $0x60] sm:$0xff]  ;;  %v54_v9 = vld [vmem:[#allocation5 + $0x58] sm:$0xff]  ;;  %v69_v10 = vld [vmem:[#allocation5 + $0xd0] sm:$0xff]  ;;  %p255_p10 = scmp.ne.s32.totalorder %s162_s25, %s254_s26  ;;  %p260_p12 = scmp.lt.s32.totalorder %s254_s26, %s254_s26 }
  0x1e   :  { %175 = vmatpush3.msra.mxu0 %v57_v3  ;;  %v53_v11 = vld [vmem:[#allocation5 + $0x50] sm:$0xff]  ;;  %v68_v12 = vld [vmem:[#allocation5 + $0xc8] sm:$0xff]  ;;  %v42_v13 = vld [vmem:[#allocation2 + $0x8] sm:$0xff] }
  0x1f   :  { %176 = vmatprep.subr.mxu0 %v72_v4  ;;  %v52_v14 = vld [vmem:[#allocation5 + $0x48] sm:$0xff]  ;;  %146 = vmatprep.mubr.f32.mxu0 %v42_v13  ;;  %v67_v15 = vld [vmem:[#allocation5 + $0xc0] sm:$0xff]  ;;  %v66_v17 = vld [vmem:[#allocation5 + $0xb8] sm:$0xff]  ;;  %p261_p13 = por %p260_p12, %p259_p11 }
  0x20   :  { %177 = vmatpush3.msra.mxu0 %v56_v5  ;;  %v51_v16 = vld [vmem:[#allocation5 + $0x40] sm:$0xff]  ;;  %v50_v18 = vld [vmem:[#allocation5 + $0x38] sm:$0xff]  ;;  %v65_v19 = vld [vmem:[#allocation5 + $0xb0] sm:$0xff] }
  0x21   :  { %178 = vmatprep.subr.mxu0 %v71_v6  ;;  %v49_v20 = vld [vmem:[#allocation5 + $0x30] sm:$0xff]  ;;  %v64_v21 = vld [vmem:[#allocation5 + $0xa8] sm:$0xff]  ;;  %v63_v23 = vld [vmem:[#allocation5 + $0xa0] sm:$0xff]  ;;  %p262_p0 = pnand %p261_p13, %p255_p10 }
  0x22   :  { %179 = vmatpush3.msra.mxu0 %v55_v7  ;;  %v48_v22 = vld [vmem:[#allocation5 + $0x28] sm:$0xff]  ;;  %v47_v24 = vld [vmem:[#allocation5 + $0x20] sm:$0xff]  ;;  %v62_v25 = vld [vmem:[#allocation5 + $0x98] sm:$0xff] }
  0x23   :  { %180 = vmatprep.subr.mxu0 %v70_v8  ;;  %v46_v26 = vld [vmem:[#allocation5 + $0x18] sm:$0xff]  ;;  %v61_v27 = vld [vmem:[#allocation5 + $0x90] sm:$0xff]  ;;  %v60_v29 = vld [vmem:[#allocation5 + $0x88] sm:$0xff] }
  0x24   :  { %181 = vmatpush3.msra.mxu0 %v54_v9  ;;  %v45_v28 = vld [vmem:[#allocation5 + $0x10] sm:$0xff]  ;;  %v44_v30 = vld [vmem:[#allocation5 + $0x8] sm:$0xff]  ;;  %v59_v31 = vld [vmem:[#allocation5 + $0x80] sm:$0xff] }
  0x25   :  { %182 = vmatprep.subr.mxu0 %v69_v10  ;;  %v43_v32 = vld [vmem:[#allocation5] sm:$0xff]  ;;  %v41_v33 = vld [vmem:[#allocation2] sm:$0xff] }
  0x26   :  { %183 = vmatpush3.msra.mxu0 %v53_v11  ;;  %v171_v35 = vld [vmem:[%s319_s2] ss:$0 sm:$0xff] }
  0x27   :  { %184 = vmatprep.subr.mxu0 %v68_v12 }
  0x28   :  { %185 = vmatpush3.msra.mxu0 %v52_v14 }
  0x29   :  { %186 = vmatprep.subr.mxu0 %v67_v15 }
  0x2a   :  { %187 = vmatpush3.msra.mxu0 %v51_v16 }
  0x2b   :  { %188 = vmatprep.subr.mxu0 %v66_v17 }
  0x2c   :  { %189 = vmatpush3.msra.mxu0 %v50_v18 }
  0x2d   :  { %190 = vmatprep.subr.mxu0 %v65_v19 }
  0x2e   :  { %191 = vmatpush3.msra.mxu0 %v49_v20 }
  0x2f   :  { %192 = vmatprep.subr.mxu0 %v64_v21 }
  0x30   :  { %193 = vmatpush3.msra.mxu0 %v48_v22 }
  0x31   :  { %194 = vmatprep.subr.mxu0 %v63_v23 }
  0x32   :  { %195 = vmatpush3.msra.mxu0 %v47_v24 }
  0x33   :  { %196 = vmatprep.subr.mxu0 %v62_v25 }
  0x34   :  { %197 = vmatpush3.msra.mxu0 %v46_v26 }
  0x35   :  { %198 = vmatprep.subr.mxu0 %v61_v27 }
  0x36   :  { %199 = vmatpush3.msra.mxu0 %v45_v28 }
  0x37   :  { %200 = vmatprep.subr.mxu0 %v60_v29 }
  0x38   :  { %201 = vmatpush3.msra.mxu0 %v44_v30 }
  0x39   :  { %202 = vmatprep.subr.mxu0 %v59_v31 }
  0x3a   :  { %203 = vmatpush3.msra.mxu0 %v43_v32 }
  0x3b   :  { %147 = vmatmul.mubr.f32.vlgmr.msra.gmra.mxu0 %v41_v33 }
  0xfb   :  { %v204_v34 = vpop.f32.mrf.mxu0 }
  0xfd   :  { %v205_v36 = vpop.f32.mrf.mxu0 }
  0xfe   :  { %v206_v37 = vadd.f32 %v205_v36, %v204_v34 }
 0x100   :  { %v149_v38 = vadd.f32 %v206_v37, %v171_v35 }
 0x102   :  { %212 = vtanh.f32 %v149_v38 }
 0x10f   :  { %v213_v39 = vpop.eup %212 }
 0x110   :  { %v153_v40 = vmul.f32 2.0, %v213_v39 }
 0x112   :  { %154 = vst [vmem:[#allocation7] sm:$0xff] %v153_v40 }
 0x113   :  { %265 = shalt.err (!%p262_p0)
}
 0x114   :  { %164 = dma.vmem_to_hbm [thread:$0]  %s162_s25, 128, %s320_s3, [#allocation4]  }
 0x115   :  { %278 = dma.done.wait [#allocation4], 128  }
 0x116   :  { %279 = vsyncadd [#allocation4], 4294967168 }
 0x117   :  { %168 = vsyncpa [#allocation3], 1 }
 0x118   :  { %169 = vsyncpa [#allocation6], 1 }
 0x119   :  { %170 = vsyncpa [#allocation4], 1 }

</bundles_post_ra>
